<compile_context>
chip_gen: v7x
topology: tpu7x:2x2x1
jax: 0.10.0
libtpu: 0.0.40
codegen_flags: <defaults>
</compile_context>

<pallas_src>
import functools

import numpy as np
import jax
import jax.numpy as jnp
from jax.experimental import pallas as pl
from jax.experimental.pallas import tpu as pltpu

NUM_HARD_NEGATIVES = 3
NUM_RANDOM_NEGATIVES = 2
MARGIN = 1.0
NORM_EPS_SQ = 1e-24          # F.normalize(eps=1e-12), applied to the squared norm
LANES = 128
SUBLANES = 8
NEG_BIG = -1e30              # column-padding value for the CE logits


# ---------------------------------------------------------------------------
# Kernel A: batched cosine-similarity matrix  sim[n, j, i] = cos(x[n, i], p[j])
# ---------------------------------------------------------------------------
def _sim_kernel(x_ref, p_ref, o_ref):
    x = x_ref[0].astype(jnp.float32)                       # (K, D)
    p = p_ref[...].astype(jnp.float32)                     # (M, D)
    x_n = x * jax.lax.rsqrt(
        jnp.maximum(jnp.sum(x * x, axis=-1, keepdims=True), NORM_EPS_SQ))
    p_n = p * jax.lax.rsqrt(
        jnp.maximum(jnp.sum(p * p, axis=-1, keepdims=True), NORM_EPS_SQ))
    # (M, D) contracted with (K, D) on their last dims -> (M, K) on the MXU.
    o_ref[0] = jax.lax.dot_general(
        p_n, x_n, (((1,), (1,)), ((), ())), preferred_element_type=jnp.float32)


def _similarity_pallas(phrase_embeddings, input_embeddings):
    N, K, D = input_embeddings.shape
    M = phrase_embeddings.shape[0]
    x = input_embeddings.astype(jnp.float32)
    p = phrase_embeddings.astype(jnp.float32)
    cost = pl.CostEstimate(
        flops=2 * N * M * K * D,
        transcendentals=N * (K + M),
        bytes_accessed=4 * (N * K * D + M * D + N * M * K),
    )
    # NOTE: for large k/m/d this block should be further tiled so the per-step
    # footprint stays well under the v7x 32 MiB scoped-VMEM default; at demo
    # sizes a per-batch block is tiny.
    return pl.pallas_call(
        _sim_kernel,
        out_shape=jax.ShapeDtypeStruct((N, M, K), jnp.float32),
        grid=(N,),
        in_specs=[
            pl.BlockSpec((1, K, D), lambda n: (n, 0, 0)),
            pl.BlockSpec((M, D), lambda n: (0, 0)),        # resident across steps
        ],
        out_specs=pl.BlockSpec((1, M, K), lambda n: (n, 0, 0)),
        compiler_params=pltpu.CompilerParams(dimension_semantics=("parallel",)),
        cost_estimate=cost,
    )(x, p)


# ---------------------------------------------------------------------------
# Kernel B: fused cross-entropy + triplet hinge reduction over anchor rows
# ---------------------------------------------------------------------------
def _loss_kernel(count_ref,                      # scalar prefetch (SMEM): [P]
                 logits_ref, labels_ref, pos_ref, neg_ref,   # inputs (VMEM tiles)
                 ce_ref, tri_ref,                # outputs (SMEM scalars)
                 acc_ce_ref, acc_tri_ref,        # resident VMEM accumulators
                 *, margin, num_neg):
    i = pl.program_id(0)
    tr = acc_ce_ref.shape[0]

    @pl.when(i == 0)
    def _init():
        acc_ce_ref[...] = jnp.zeros_like(acc_ce_ref)
        acc_tri_ref[...] = jnp.zeros_like(acc_tri_ref)

    # Row-validity mask built in-kernel from an iota vs. the prefetched count
    # (no mask array ever touches HBM).
    row_ids = jax.lax.broadcasted_iota(jnp.int32, (tr, 1), 0) + i * tr
    valid = (row_ids < count_ref[0]).astype(jnp.float32)       # (TR, 1)

    # ---- cross entropy: logsumexp(logits) - logits[label] ----
    logits = logits_ref[...].astype(jnp.float32)               # (TR, M_pad)
    labels = labels_ref[...]                                   # (TR, 1) int32
    col_ids = jax.lax.broadcasted_iota(jnp.int32, logits.shape, 1)
    onehot = (col_ids == labels).astype(jnp.float32)
    mx = jnp.max(logits, axis=-1, keepdims=True)
    lse = mx + jnp.log(jnp.sum(jnp.exp(logits - mx), axis=-1, keepdims=True))
    tgt = jnp.sum(logits * onehot, axis=-1, keepdims=True)
    acc_ce_ref[...] += (lse - tgt) * valid                     # (TR, 1)

    # ---- triplet with distance 1 - cos:  relu(cos_an - cos_ap + margin) ----
    pos = pos_ref[...]                                         # (TR, 1)
    neg = neg_ref[...]                                         # (TR, NUM_NEG)
    acc_tri_ref[...] += jnp.maximum(neg - pos + margin, 0.0) * valid

    @pl.when(i == pl.num_programs(0) - 1)
    def _finalize():
        pcount = count_ref[0].astype(jnp.float32)
        ce_ref[0, 0] = jnp.sum(acc_ce_ref[...]) / pcount
        tri_ref[0, 0] = jnp.sum(acc_tri_ref[...]) / (pcount * num_neg)


def _losses_pallas(ce_logits, labels, pos_cos, neg_cos, *, margin=MARGIN):
    P, M = ce_logits.shape
    num_neg = neg_cos.shape[1]
    TR = SUBLANES
    P_pad = ((P + TR - 1) // TR) * TR
    M_pad = ((M + LANES - 1) // LANES) * LANES

    # Device-side padding (no host round trip).
    logits_pad = jnp.full((P_pad, M_pad), NEG_BIG, jnp.float32)
    logits_pad = logits_pad.at[:P, :M].set(ce_logits.astype(jnp.float32))
    labels_pad = jnp.zeros((P_pad, 1), jnp.int32).at[:P, 0].set(labels.astype(jnp.int32))
    pos_pad = jnp.zeros((P_pad, 1), jnp.float32).at[:P, 0].set(pos_cos.astype(jnp.float32))
    neg_pad = jnp.full((P_pad, num_neg), -2.0, jnp.float32)
    neg_pad = neg_pad.at[:P, :].set(neg_cos.astype(jnp.float32))
    counts = jnp.array([P], jnp.int32)

    kernel = functools.partial(_loss_kernel, margin=float(margin), num_neg=int(num_neg))
    ce, tri = pl.pallas_call(
        kernel,
        out_shape=(jax.ShapeDtypeStruct((1, 1), jnp.float32),
                   jax.ShapeDtypeStruct((1, 1), jnp.float32)),
        grid_spec=pltpu.PrefetchScalarGridSpec(
            num_scalar_prefetch=1,
            grid=(P_pad // TR,),
            in_specs=[
                pl.BlockSpec((TR, M_pad), lambda i, c: (i, 0)),
                pl.BlockSpec((TR, 1), lambda i, c: (i, 0)),
                pl.BlockSpec((TR, 1), lambda i, c: (i, 0)),
                pl.BlockSpec((TR, num_neg), lambda i, c: (i, 0)),
            ],
            out_specs=(
                pl.BlockSpec(memory_space=pltpu.MemorySpace.SMEM),
                pl.BlockSpec(memory_space=pltpu.MemorySpace.SMEM),
            ),
            scratch_shapes=[
                pltpu.VMEM((TR, 1), jnp.float32),
                pltpu.VMEM((TR, num_neg), jnp.float32),
            ],
        ),
        compiler_params=pltpu.CompilerParams(dimension_semantics=("arbitrary",)),
    )(counts, logits_pad, labels_pad, pos_pad, neg_pad)
    return ce[0, 0], tri[0, 0]


# ---------------------------------------------------------------------------
# AlignmentLoss.forward equivalent
# ---------------------------------------------------------------------------
def alignment_loss(phrase_embeddings, input_embeddings, indices, temperature,
                   num_hard_negatives=NUM_HARD_NEGATIVES,
                   num_random_negatives=NUM_RANDOM_NEGATIVES,
                   margin=MARGIN, rng_seed=0, return_aux=False):
    batch_idxs = jnp.asarray(indices[0], jnp.int32)
    phrase_emb_idxs = jnp.asarray(indices[1], jnp.int32)
    input_emb_idxs = jnp.asarray(indices[2], jnp.int32)
    N, K, D = input_embeddings.shape
    P = int(batch_idxs.shape[0])

    # (N, m, k) cosine-similarity matrix -- Pallas kernel A.
    sim = _similarity_pallas(phrase_embeddings, input_embeddings)

    # --- data-dependent negative selection (JAX + host RNG glue) ---
    rows = sim[batch_idxs, phrase_emb_idxs]                          # (P, K)
    neg_rows = rows.at[jnp.arange(P), input_emb_idxs].set(-jnp.inf)
    hard_idx = jax.lax.top_k(neg_rows, num_hard_negatives)[1]        # (P, H)

    # TODO(synk): torch.randperm-based random-negative sampling has no Pallas
    # equivalent; replicated with a deterministic host-side numpy RNG.
    rng = np.random.RandomState(rng_seed)
    rand_rows = []
    for inp in np.asarray(input_emb_idxs).tolist():
        perm = rng.permutation(K - 1)
        perm = perm[perm != inp][:num_random_negatives]
        rand_rows.append(perm)
    rand_idx = jnp.asarray(np.stack(rand_rows), jnp.int32)           # (P, R)

    neg_idx = jnp.concatenate([hard_idx.astype(jnp.int32), rand_idx], axis=1)

    pos_cos = rows[jnp.arange(P), input_emb_idxs]                    # (P,)
    neg_cos = jnp.take_along_axis(rows, neg_idx, axis=1)             # (P, NEG)
    ce_logits = sim[batch_idxs, :, input_emb_idxs] * jnp.float32(temperature)

    ce_loss, tri_loss = _losses_pallas(ce_logits, phrase_emb_idxs, pos_cos, neg_cos,
                                       margin=margin)
    out = dict(triplet=tri_loss, ce=ce_loss)
    if return_aux:
        return out, dict(neg_idx=neg_idx)
    return out


# ---------------------------------------------------------------------------
# Pure-JAX reference (same negative indices passed in, so only kernel math is
# being validated -- the discrete selection is plain-JAX/host glue anyway).
# ---------------------------------------------------------------------------
def _reference(phrase_embeddings, input_embeddings, indices, temperature, neg_idx,
               margin=MARGIN):
    batch_idxs, phrase_emb_idxs, input_emb_idxs = (jnp.asarray(a) for a in indices)
    x = input_embeddings.astype(jnp.float32)
    p = phrase_embeddings.astype(jnp.float32)
    x_n = x * jax.lax.rsqrt(jnp.maximum(jnp.sum(x * x, -1, keepdims=True), NORM_EPS_SQ))
    p_n = p * jax.lax.rsqrt(jnp.maximum(jnp.sum(p * p, -1, keepdims=True), NORM_EPS_SQ))
    sim = jnp.einsum("md,nkd->nmk", p_n, x_n)
    P = batch_idxs.shape[0]
    rows = sim[batch_idxs, phrase_emb_idxs]                          # (P, K)
    pos = rows[jnp.arange(P), input_emb_idxs]                        # (P,)
    neg = jnp.take_along_axis(rows, neg_idx, axis=1)                 # (P, NEG)
    triplet = jnp.mean(jnp.maximum(neg - pos[:, None] + margin, 0.0))
    logits = sim[batch_idxs, :, input_emb_idxs] * jnp.float32(temperature)
    mx = jnp.max(logits, axis=-1, keepdims=True)
    lse = (mx + jnp.log(jnp.sum(jnp.exp(logits - mx), axis=-1, keepdims=True)))[:, 0]
    ce = jnp.mean(lse - logits[jnp.arange(P), phrase_emb_idxs])
    return dict(triplet=triplet, ce=ce)


if __name__ == "__main__":
    key = jax.random.PRNGKey(0)
    N, K, M, D = 2, 8, 16, 128          # batch, inputs/batch, phrases, hidden
    kp, ki = jax.random.split(key)
    phrase_embeddings = jax.random.normal(kp, (M, D), dtype=jnp.float32)
    input_embeddings = jax.random.normal(ki, (N, K, D), dtype=jnp.float32)

    batch_idxs = jnp.array([0, 0, 0, 0, 0, 1, 1, 1, 1, 1], dtype=jnp.int32)
    phrase_emb_idxs = jnp.array([0, 1, 2, 3, 4, 5, 6, 7, 8, 9], dtype=jnp.int32)
    input_emb_idxs = jnp.array([2, 5, 0, 7, 3, 1, 4, 6, 0, 5], dtype=jnp.int32)
    indices = (batch_idxs, phrase_emb_idxs, input_emb_idxs)
    temperature = 5.0

    out, aux = alignment_loss(phrase_embeddings, input_embeddings, indices,
                              temperature, rng_seed=0, return_aux=True)
    jax.block_until_ready(out["triplet"])
    jax.block_until_ready(out["ce"])

    ref = _reference(phrase_embeddings, input_embeddings, indices, temperature,
                     aux["neg_idx"])
    # Loose tolerance: both paths run the cosine matmul on the MXU, whose default
    # f32 handling (bf16 passes) can differ slightly between XLA and Mosaic.
    np.testing.assert_allclose(np.asarray(out["ce"]), np.asarray(ref["ce"]),
                               rtol=5e-2, atol=5e-2)
    np.testing.assert_allclose(np.asarray(out["triplet"]), np.asarray(ref["triplet"]),
                               rtol=5e-2, atol=5e-2)

    print("KERNEL_OK")
</pallas_src>

<mosaic_0001>
module attributes {stable_mosaic.version = 11 : i64} {
  func.func @_sim_kernel(%arg0: i32, %arg1: memref<1x8x128xf32, #tpu.memory_space<vmem>>, %arg2: memref<16x128xf32, #tpu.memory_space<vmem>>, %arg3: memref<1x16x8xf32, #tpu.memory_space<vmem>>) attributes {dimension_semantics = [#tpu.dimension_semantics<parallel>], iteration_bounds = array<i64: 2>, scalar_prefetch = 0 : i64, scratch_operands = 0 : i64, tpu.core_type = #tpu.core_type<tc>, window_params = [{transform_indices = @transform_0, window_bounds = array<i64: 1, 8, 128>}, {pipeline_mode = #tpu.pipeline_mode<synchronous>, transform_indices = @transform_1, window_bounds = array<i64: 16, 128>}, {transform_indices = @transform_2, window_bounds = array<i64: 1, 16, 8>}]} {
    %c0 = arith.constant 0 : index
    %c0_0 = arith.constant 0 : index
    %c0_1 = arith.constant 0 : index
    %0 = vector.load %arg1[%c0, %c0_0, %c0_1] : memref<1x8x128xf32, #tpu.memory_space<vmem>>, vector<1x8x128xf32>
    %1 = vector.shape_cast %0 : vector<1x8x128xf32> to vector<8x128xf32>
    %c0_2 = arith.constant 0 : index
    %c0_3 = arith.constant 0 : index
    %2 = vector.load %arg2[%c0_2, %c0_3] : memref<16x128xf32, #tpu.memory_space<vmem>>, vector<16x128xf32>
    %3 = arith.mulf %1, %1 : vector<8x128xf32>
    %cst = arith.constant dense<0.000000e+00> : vector<8xf32>
    %4 = vector.multi_reduction <add>, %3, %cst [1] : vector<8x128xf32> to vector<8xf32>
    %5 = vector.shape_cast %4 : vector<8xf32> to vector<8x1xf32>
    %cst_4 = arith.constant 1.000000e-24 : f32
    %6 = vector.broadcast %cst_4 : f32 to vector<8x1xf32>
    %7 = arith.maximumf %5, %6 : vector<8x1xf32>
    %8 = math.rsqrt %7 : vector<8x1xf32>
    %9 = vector.broadcast %8 : vector<8x1xf32> to vector<8x128xf32>
    %10 = arith.mulf %1, %9 : vector<8x128xf32>
    %11 = arith.mulf %2, %2 : vector<16x128xf32>
    %cst_5 = arith.constant dense<0.000000e+00> : vector<16xf32>
    %12 = vector.multi_reduction <add>, %11, %cst_5 [1] : vector<16x128xf32> to vector<16xf32>
    %13 = vector.shape_cast %12 : vector<16xf32> to vector<16x1xf32>
    %cst_6 = arith.constant 1.000000e-24 : f32
    %14 = vector.broadcast %cst_6 : f32 to vector<16x1xf32>
    %15 = arith.maximumf %13, %14 : vector<16x1xf32>
    %16 = math.rsqrt %15 : vector<16x1xf32>
    %17 = vector.broadcast %16 : vector<16x1xf32> to vector<16x128xf32>
    %18 = arith.mulf %2, %17 : vector<16x128xf32>
    %cst_7 = arith.constant dense<0.000000e+00> : vector<16x8xf32>
    %19 = tpu.matmul %18, %10, %cst_7 {dimension_numbers = #tpu.dot_dimension_numbers<[1], [1], [0], [0], [0, 0, 1, 0], [], []>} : vector<16x128xf32>, vector<8x128xf32>, vector<16x8xf32> -> vector<16x8xf32>
    %c0_8 = arith.constant 0 : index
    %c0_9 = arith.constant 0 : index
    %c0_10 = arith.constant 0 : index
    %20 = vector.load %arg3[%c0_8, %c0_9, %c0_10] : memref<1x16x8xf32, #tpu.memory_space<vmem>>, vector<1x16x8xf32>
    %21 = vector.shape_cast %20 : vector<1x16x8xf32> to vector<16x8xf32>
    %22 = vector.shape_cast %19 : vector<16x8xf32> to vector<1x16x8xf32>
    tpu.vector_store %arg3[%c0_8, %c0_9, %c0_10], %22 {strides = array<i32>} : memref<1x16x8xf32, #tpu.memory_space<vmem>>, vector<1x16x8xf32>,
    return
  }
  func.func @transform_0(%arg0: i32) -> (i32, i32, i32) {
    %c0_i32 = arith.constant 0 : i32
    %c0_i32_0 = arith.constant 0 : i32
    %c0_i32_1 = arith.constant 0 : i32
    return %arg0, %c0_i32, %c0_i32_0 : i32, i32, i32
  }
  func.func @transform_1(%arg0: i32) -> (i32, i32) {
    %c0_i32 = arith.constant 0 : i32
    %c0_i32_0 = arith.constant 0 : i32
    %c0_i32_1 = arith.constant 0 : i32
    return %c0_i32, %c0_i32_0 : i32, i32
  }
  func.func @transform_2(%arg0: i32) -> (i32, i32, i32) {
    %c0_i32 = arith.constant 0 : i32
    %c0_i32_0 = arith.constant 0 : i32
    %c0_i32_1 = arith.constant 0 : i32
    return %arg0, %c0_i32, %c0_i32_0 : i32, i32, i32
  }
}

</mosaic_0001>

<bundles_post_ra>
// kernel: tpu_custom_call.1
= control target key start
LH: loop header
LB: loop body
LE: loop exit
PB: predicated region body
PF: predicated region fallthrough
CT: control target
= control target key end

     0   :  { %7 = vsyncpa [#allocation3], 0  ;;  %s688_s0 = inlined_call_operand.hbm [shape: f32[2,8,128], index: 0, kind: input, shape index: {}]   ;;  %s689_s1 = inlined_call_operand.hbm [shape: f32[16,128], index: 1, kind: input, shape index: {}]   ;;  %s690_s2 = inlined_call_operand.vmem [shape: f32[2,16,8], index: 2, kind: output, shape index: {}]  }
   0x1   :  { %9 = vsyncpa [#allocation3 + $0x1], 0 }
   0x2   :  { %10 = vsyncpa [#allocation5], 0  ;;  %s549_s9 = smov 0   ;;  %s551_s10 = smov 0  }
   0x3   :  { %s553_s11 = smov 0   ;;  %s555_s12 = smov 0  }
   0x4 LB: > { %s568_s13 = sadd.s32 4294967295, %s528_s12   ;;  %p36_p0 = scmp.ne.s32.totalorder %s520_s10, %s516_s9  ;;  %s528_s12 = sphi %s555_s12, %s705_s12   ;;  %s524_s11 = sphi %s553_s11, %s704_s11   ;;  %s520_s10 = sphi %s551_s10, %s703_s10   ;;  %s516_s9 = sphi %s549_s9, %s702_s9  }
   0x5   : > { %p691_p1 = scmp.eq.s32.totalorder %s568_s13, 0  ;;  %p353_p2 = scmp.ge.s32.totalorder %s528_s12, 1 }
   0x6   : > { %p94_p3 = scmp.lt.s32.totalorder %s528_s12, 3  ;;  %s530_s16 = smov [#allocation4]  }
   0x7   : > { %p576_p4 = por %p691_p1, %p36_p0  ;;  %s106_s17 = sshll.u32 %s530_s16, 4  ;;  %s107_s17 = int_to_ptr.vmem [resolvable:$true] %s106_s17 }
   0x8   : > { %p580_p5 = pnand %p353_p2, %p94_p3  ;;  %s593_s19 = sadd.s32 1, %s528_s12  }
   0x9   : > { %s694_s14 = scalar_select %p576_p4, 1, 0 }
   0xa   : > { %s695_s15 = scalar_select %p580_p5, 1, 0 }
   0xb   : > { %p380_p6 = pneg %p580_p5  ;;  %s23_s20 = sadd.s32 1, %s524_s11 }
   0xc   : > { %s20_s21 = ssub.s32 %s528_s12, %s593_s19  ;;  %s432_s24 = scalar_lea.hbm %s689_s1, 256 }
   0xd   : > { %p588_p7 = pnand %p380_p6, %p691_p1  ;;  %p433_p8 = scmp.ne.s32.totalorder %s689_s1, %s432_s24 }
   0xe   : > { %p439_p12 = scmp.lt.u32.totalorder %s432_s24, %s689_s1 }
   0xf   : > { %p434_p9 = pneg %p588_p7 }
  0x11   : > { %p435_p10 = pnand %p434_p9, %p433_p8 }
  0x13   : > { %p436_p11 = pneg %p435_p10 }
  0x15   : > { %p441_p13 = pnand %p439_p12, %p436_p11 }
  0x17   : > { %444 = shalt.err (!%p441_p13)
}
  0x18   : > { %s445_s29 = scalar_lea.vmem %s107_s17, 256  ;;  %p453_p6 = scmp.lt.s32.totalorder %s107_s17, %s107_s17 }
  0x19   : > { %p446_p0 = scmp.ne.s32.totalorder %s107_s17, %s445_s29  ;;  %p454_p1 = scmp.lt.s32.totalorder %s445_s29, %s445_s29 }
  0x1b   : > { %p448_p2 = pnand %p446_p0, %p434_p9  ;;  %p455_p4 = por %p454_p1, %p453_p6 }
  0x1d   : > { %p449_p3 = pneg %p448_p2 }
  0x1f   : > { %p456_p5 = pnand %p455_p4, %p449_p3 }
  0x21   : > { %459 = shalt.err (!%p456_p5)
}
  0x22   : > { %s531_s30 = smov 128   ;;  %s532_s3 = smov 8  }
  0x23   : > { %383 = dma.hbm_to_vmem [thread:$0]  (!%p588_p7), %s689_s1, 256, %s107_s17, [#allocation5], %s531_s30, %s531_s30, %s532_s3  }
  0x24   : > { %p21_p8 = scmp.eq.s32.totalorder %s20_s21, 0  ;;  %p30_p9 = scmp.ne.s32.totalorder %s524_s11, %s520_s10 }
  0x25   : > { %p31_p1 = scmp.eq.s32.totalorder %s528_s12, 0  ;;  %p389_p4 = scmp.lt.s32.totalorder %s528_s12, 2 }
  0x26   : > { %s619_s6 = scalar_select %p21_p8, %s524_s11, %s23_s20  }
  0x27   : > { %p32_p5 = por %p31_p1, %p30_p9  ;;  %s120_s7 = sand.u32 1, %s524_s11  }
  0x28   : > { %s356_s8 = sshll.u32 %s120_s7, 3  ;;  %s357_s9 = sshll.u32 %s528_s12, 7 }
  0x29   : > { %s626_s23 = scalar_lea.hbm %s688_s0, %s357_s9  ;;  %s124_s17 = scalar_lea.vmem [#allocation2], %s356_s8 }
  0x2a   : > { %s131_s18 = sshll.u32 %s124_s17, 4  ;;  %p630_p7 = pnand %p389_p4, %p32_p5  ;;  %s628_s18 = int_to_ptr.vmem [resolvable:$true] %s131_s18 }
  0x2b   : > { %s121_s12 = scalar_lea.sflag [#allocation3], %s120_s7  ;;  %s460_s21 = scalar_lea.hbm %s626_s23, 128 }
  0x2c   : > { %p461_p10 = scmp.ne.s32.totalorder %s626_s23, %s460_s21  ;;  %p462_p11 = pneg %p630_p7 }
  0x2d   : > { %s465_s26 = scalar_lea.hbm %s688_s0, 256  ;;  %p466_p0 = scmp.lt.u32.totalorder %s626_s23, %s688_s0 }
  0x2e   : > { %p463_p12 = pnand %p462_p11, %p461_p10  ;;  %p467_p2 = scmp.lt.u32.totalorder %s465_s26, %s460_s21 }
  0x2f   : > { %p469_p6 = scmp.lt.u32.totalorder %s460_s21, %s626_s23 }
  0x30   : > { %p464_p13 = pneg %p463_p12  ;;  %p468_p3 = por %p467_p2, %p466_p0 }
  0x32   : > { %p470_p8 = por %p469_p6, %p468_p3 }
  0x34   : > { %p471_p9 = pnand %p470_p8, %p464_p13 }
  0x36   : > { %474 = shalt.err (!%p471_p9)
}
  0x37   : > { %s475_s29 = scalar_lea.vmem %s628_s18, 128  ;;  %s533_s30 = smov [#allocation2]  }
  0x38   : > { %p476_p1 = scmp.ne.s32.totalorder %s628_s18, %s475_s29  ;;  %s480_s3 = sshll.u32 %s533_s30, 4  ;;  %s481_s3 = int_to_ptr.vmem [resolvable:$false] %s480_s3 }
  0x39   : > { %s482_s4 = scalar_lea.vmem %s481_s3, 256  ;;  %p483_p10 = scmp.lt.s32.totalorder %s628_s18, %s481_s3 }
  0x3a   : > { %p478_p4 = pnand %p476_p1, %p462_p11  ;;  %p484_p12 = scmp.lt.s32.totalorder %s482_s4, %s475_s29 }
  0x3c   : > { %p479_p5 = pneg %p478_p4  ;;  %p485_p0 = por %p484_p12, %p483_p10 }
  0x3e   : > { %p486_p2 = pnand %p485_p0, %p479_p5 }
  0x40   : > { %489 = shalt.err (!%p486_p2)
}
  0x41   : > { %387 = dma.hbm_to_vmem [thread:$0]  (!%p630_p7), %s626_s23, 128, %s628_s18, %s121_s12  }
  0x42   : > { %p698_p13 = scmp.ne.s32.totalorder %s695_s15, 0 }
  0x43   : > { %s142_s5 = sand.u32 (!%p698_p13), 1, %s520_s10   ;;  %p699_p11 = scmp.ne.s32.totalorder (!%p698_p13), %s694_s14, 0 }
  0x44   : > { %140 = sbr.rel (%p698_p13) target bundleno = 458 (0x1ca), region = 28  ;;  %s359_s7 = sshll.u32 (!%p698_p13), %s142_s5, 3 }
  0x45   : > { %s143_s8 = scalar_lea.sflag (!%p698_p13), [#allocation3], %s142_s5  ;;  %s146_s9 = scalar_lea.vmem (!%p698_p13), [#allocation2], %s359_s7 }
  0x4b   : > { %507 = dma.done.wait (%p699_p11), %s143_s8, 128  }
  0x4c   : > { %509 = vsyncadd (%p699_p11), %s143_s8, 4294967168  ;;  %p700_p3 = scmp.eq.s32.totalorder %s568_s13, 0 }
  0x4e   : > { %511 = dma.done.wait (%p700_p3), [#allocation5], 256   ;;  %p701_p6 = pmov %p700_p3 }
  0x4f   : > { %v176_v0 = vld [vmem:[%s146_s9] sm:$0xff]  ;;  %v177_v1 = vld [vmem:[#allocation4] sm:$0xff]  ;;  %v178_v2 = vld [vmem:[#allocation4 + $0x8] sm:$0xff]  ;;  %p171_p7 = scmp.lt.s32.totalorder %s568_s13, 1  ;;  %vm272_vm0 = vcmask 64512  }
  0x50   : > { %513 = vsyncadd (%p701_p6), [#allocation5], 4294967040  ;;  %v179_v3 = vmul.f32 %v176_v0, %v176_v0  ;;  %v186_v4 = vmul.f32 %v178_v2, %v178_v2  ;;  %v185_v5 = vmul.f32 %v177_v1, %v177_v1 }
  0x51   : > { %s707_s13 = smov (!%p171_p7, %s568_s13), 1 }
  0x52   : > { %180 = vadd.xlane.f32.xlu0 %v179_v3  ;;  %189 = vadd.xlane.f32.xlu1 %v186_v4  ;;  %s365_s14 = sshll.u32 %s707_s13, 4 }
  0x53   : > { %s175_s22 = scalar_lea.vmem %s690_s2, %s365_s14 }
  0x56   : > { %187 = vadd.xlane.f32.xlu0 %v185_v5 }
  0xdf   : > { %v181_v6 = vpop.xlane.xlu0 %180  ;;  %v190_v7 = vpop.xlane.xlu1 %189 }
  0xe0   : > { %v182_v8 = vmax.f32 %v181_v6, 1e-24  ;;  %v192_v9 = vmax.f32 %v190_v7, 1e-24 }
  0xe2   : > { %426 = vrsqrt.f32 %v182_v8 }
  0xe3   : > { %v188_v10 = vpop.xlane.xlu0 %187  ;;  %428 = vrsqrt.f32 %v192_v9 }
  0xe4   : > { %v191_v11 = vmax.f32 %v188_v10, 1e-24 }
  0xe6   : > { %430 = vrsqrt.f32 %v191_v11 }
  0xec   : > { %v427_v12 = vpop.eup %426 }
  0xed   : > { %v429_v13 = vpop.eup %428  ;;  %v184_v14 = vmul.f32 %v427_v12, %v176_v0 }
  0xee   : > { %v196_v16 = vmul.f32 %v429_v13, %v178_v2 }
  0xef   : > { %369 = vmatprep.subr.mxu0 %v184_v14 }
  0xf0   : > { %v431_v15 = vpop.eup %430  ;;  %370 = vmatpush3.xpose.msra.mxu0 %v184_v14 }
  0xf1   : > { %v195_v17 = vmul.f32 %v431_v15, %v177_v1 }
  0xf3   : > { %371 = vmatprep.mubr.f32.mxu0 %v195_v17 }
  0xf4   : > { %372 = vmatmul.mubr.f32.vlgmr.msra.gmra.mrb[0].mxu0 %v196_v16 }
 0x1c7   : > { %v373_v18 = vpop.f32.mrb[0].mxu0 }
 0x1c8   : > { %274 = vst.msk [vmem:[%s175_s22 + $0x8] sm:$0xff] %vm272_vm0, %v373_v18  ;;  %v263_v19 = vpop.f32.mrb[1].mxu0 }
 0x1c9   : > { %273 = vst.msk [vmem:[%s175_s22] sm:$0xff] %vm272_vm0, %v263_v19 }
 0x1ca PF: > { %p13_p8 = scmp.ge.s32.totalorder %s593_s19, 4   ;;  %s702_s9 = smov %s520_s10 }
 0x1cb   : > { %s703_s10 = smov %s524_s11  ;;  %s704_s11 = smov %s619_s6 }
 0x1cc   : > { %s705_s12 = smov %s593_s19  ;;  %15 = sbr.rel (!%p13_p8) target bundleno = 4 (0x4), region = 72 }
 0x1d3   :  { %296 = vsyncpa [#allocation3], 1 }
 0x1d4   :  { %298 = vsyncpa [#allocation3 + $0x1], 1 }
 0x1d5   :  { %299 = vsyncpa [#allocation5], 1 }

</bundles_post_ra>
